<compile_context>
chip_gen: v6e
topology: v6e:2x2x1
jax: 0.10.0
libtpu: 0.0.40
codegen_flags: <defaults>
</compile_context>

<pallas_src>
import math

import jax
import jax.numpy as jnp
from jax.experimental import pallas as pl
from jax.experimental.pallas import tpu as pltpu


def _round_up(v, m):
    return ((v + m - 1) // m) * m


def _round_down(v, m):
    return (v // m) * m


# ----------------------------------------------------------------------------
# Kernel bodies (elementwise; compute in f32, store in the output dtype).
# ----------------------------------------------------------------------------
def _cwlrelu_bias_kernel(x_ref, p_ref, o_ref):
    # x: (TR, TL)   p: (TR, 2) f32 with [:, 0] = (slope - 1), [:, 1] = bias
    x = x_ref[...].astype(jnp.float32)           # no-op when x is already f32
    p = p_ref[...]
    y = x + jnp.minimum(x, 0.0) * p[:, 0:1] + p[:, 1:2]
    o_ref[...] = y.astype(o_ref.dtype)


def _cwlrelu_nobias_kernel(x_ref, p_ref, o_ref):
    # x: (TR, TL)   p: (TR, 1) f32 = (slope - 1)
    x = x_ref[...].astype(jnp.float32)
    y = x + jnp.minimum(x, 0.0) * p_ref[...]
    o_ref[...] = y.astype(o_ref.dtype)


# ----------------------------------------------------------------------------
# Tile selection: full-row contiguous blocks, ~target_bytes per x block,
# guaranteed >=2 blocks along a parallel axis when the shape allows (v7x).
# ----------------------------------------------------------------------------
def _choose_tiles(R, HW, itemsize, target_bytes):
    sub = 8 if itemsize >= 4 else (16 if itemsize == 2 else 32)  # sublane packing

    # Lane tile: prefer the full (contiguous) row.  If HW is not 128-aligned,
    # the only legal choices are multiples of 128 (masked edges) or the full
    # dim; the full dim keeps one contiguous HBM run per row, so take it.
    if HW % 128 == 0:
        TL = min(HW, max(128, _round_down(target_bytes // (sub * itemsize), 128)))
    else:
        TL = HW

    # Row tile: fill the block budget; multiple of the sublane packing (or the
    # full dim when R is smaller than one packed tile).
    row_bytes = max(1, TL * itemsize)
    if R <= sub:
        TR = R
    else:
        TR = max(sub, min(_round_down(R, sub),
                          _round_down(target_bytes // row_bytes, sub)))

    # v7x has 2 TensorCores: make sure at least one "parallel" axis has >= 2
    # blocks whenever the shape can be split.
    if pl.cdiv(R, TR) == 1 and pl.cdiv(HW, TL) == 1:
        if R > sub:
            TR = _round_up(pl.cdiv(R, 2), sub)          # guarantees cdiv(R, TR) >= 2
        elif HW % 128 == 0 and HW >= 256:
            TL = _round_up(pl.cdiv(HW, 2), 128)         # guarantees cdiv(HW, TL) >= 2

    return TR, TL


# ----------------------------------------------------------------------------
# Wrapper
# ----------------------------------------------------------------------------
def channelwise_leaky_relu(x, neg_slope, bias=None, *, bound=0,
                           target_block_bytes=4 * 1024 * 1024,
                           donate_input=False):
    """x: (N, C, ...) f32 or bf16. neg_slope/bias: (C,) (bias may be None)."""
    assert x.ndim >= 2
    N, C = x.shape[0], x.shape[1]
    HW = int(math.prod(x.shape[2:])) if x.ndim > 2 else 1
    R = N * C

    # Per-channel parameter transform: done ONCE here, in f32 (PyTorch keeps
    # fp32 parameters), never in the kernel body.
    slope = neg_slope.astype(jnp.float32)
    if bound != 0:                                   # static Python hyperparameter
        slope = jnp.tanh(slope / bound) * bound
    scale = slope - 1.0                              # out = x + min(x, 0)*scale [+ bias]

    scale_rows = jnp.broadcast_to(scale[None, :], (N, C)).reshape(R)
    if bias is not None:
        bias_rows = jnp.broadcast_to(bias.astype(jnp.float32)[None, :], (N, C)).reshape(R)
        params = jnp.stack([scale_rows, bias_rows], axis=-1)     # (R, 2) fused stream
        kernel = _cwlrelu_bias_kernel
        P = 2
    else:
        params = scale_rows.reshape(R, 1)                         # (R, 1)
        kernel = _cwlrelu_nobias_kernel
        P = 1

    # Row-major (N*C, HW): full sublane packing even when C < 8; free reshape.
    x2 = x.reshape(R, HW)
    itemsize = jnp.dtype(x.dtype).itemsize
    TR, TL = _choose_tiles(R, HW, itemsize, target_block_bytes)
    grid = (pl.cdiv(R, TR), pl.cdiv(HW, TL))          # h innermost: params hoisted over it

    out2 = pl.pallas_call(
        kernel,
        out_shape=jax.ShapeDtypeStruct((R, HW), x.dtype),
        grid_spec=pltpu.PrefetchScalarGridSpec(
            num_scalar_prefetch=0,
            grid=grid,
            in_specs=[
                pl.BlockSpec((TR, TL), lambda r, h: (r, h)),
                pl.BlockSpec((TR, P), lambda r, h: (r, 0)),   # grid-invariant along h
            ],
            out_specs=pl.BlockSpec((TR, TL), lambda r, h: (r, h)),
        ),
        compiler_params=pltpu.CompilerParams(
            dimension_semantics=("parallel", "parallel"),
            # ~4 MiB x blocks -> ~16 MiB double-buffered in+out footprint.
            # 48 MiB scoped limit is safe on v7x (64 MiB physical) and leaves
            # plenty of headroom on v5e/v6e (128 MiB physical).
            vmem_limit_bytes=48 * 1024 * 1024,
        ),
        # Optional: donate x's buffer for the output (halves HBM allocation when
        # the caller no longer needs the input). Traffic is unchanged.
        input_output_aliases=({0: 0} if donate_input else {}),
    )(x2, params)

    return out2.reshape(x.shape)


# ----------------------------------------------------------------------------
# Pure-JAX reference (mirrors the PyTorch forward, in f32)
# ----------------------------------------------------------------------------
def _reference(x, neg_slope, bias, bound=0):
    shape = (1, -1) + (1,) * (x.ndim - 2)
    slope = neg_slope.reshape(shape).astype(jnp.float32)
    if bound != 0:
        slope = jnp.tanh(slope / bound) * bound
    xf = x.astype(jnp.float32)
    out = xf + (-jnp.maximum(-xf, 0.0)) * (slope - 1.0)
    if bias is not None:
        out = out + bias.reshape(shape).astype(jnp.float32)
    return out.astype(x.dtype)


if __name__ == "__main__":
    key = jax.random.PRNGKey(0)
    kx, kb = jax.random.split(key)
    N, C, H, W = 2, 4, 16, 16

    x = jax.random.normal(kx, (N, C, H, W), dtype=jnp.float32)

    # Module __init__ parameters: neg_slope = 0.5 * ones(C), bias = zeros(C).
    neg_slope = jnp.ones((C,), dtype=jnp.float32) * 0.5
    bias0 = jnp.zeros((C,), dtype=jnp.float32)
    # A non-trivial bias for more rigorous checks of the bias path.
    bias_r = jax.random.normal(kb, (C,), dtype=jnp.float32)

    # 1) Default module config: bias=zeros, bound=0.
    out = jax.block_until_ready(channelwise_leaky_relu(x, neg_slope, bias0, bound=0))
    assert out.shape == (N, C, H, W)
    assert jnp.allclose(out, _reference(x, neg_slope, bias0, 0), atol=1e-6, rtol=1e-6)

    # 2) bound != 0 (tanh slope transform, precomputed in the wrapper) + real bias.
    out = jax.block_until_ready(channelwise_leaky_relu(x, neg_slope, bias_r, bound=1.0))
    assert jnp.allclose(out, _reference(x, neg_slope, bias_r, 1.0), atol=1e-6, rtol=1e-6)

    # 3) bias=None path (single (R, 1) parameter stream, no bias add).
    out = jax.block_until_ready(channelwise_leaky_relu(x, neg_slope, None, bound=0))
    assert jnp.allclose(out, _reference(x, neg_slope, None, 0), atol=1e-6, rtol=1e-6)

    # 4) Non-128-aligned spatial size: no padding / slicing, full-dim lane block.
    xu = jax.random.normal(kx, (N, C, 15, 15), dtype=jnp.float32)
    out = jax.block_until_ready(channelwise_leaky_relu(xu, neg_slope, bias_r, bound=0.5))
    assert jnp.allclose(out, _reference(xu, neg_slope, bias_r, 0.5), atol=1e-6, rtol=1e-6)

    # 5) bf16 I/O path (f32 parameter math and in-kernel compute, bf16 HBM traffic).
    xb = x.astype(jnp.bfloat16)
    out = jax.block_until_ready(channelwise_leaky_relu(xb, neg_slope, bias_r, bound=0))
    ref = _reference(xb, neg_slope, bias_r, 0)
    assert out.dtype == jnp.bfloat16
    assert jnp.allclose(out.astype(jnp.float32), ref.astype(jnp.float32),
                        atol=2e-2, rtol=2e-2)

    print("KERNEL_OK")
</pallas_src>

<mosaic_0001>
module attributes {stable_mosaic.version = 11 : i64} {
  func.func @_cwlrelu_bias_kernel(%arg0: i32, %arg1: i32, %arg2: memref<8x128xf32, #tpu.memory_space<vmem>>, %arg3: memref<8x2xf32, #tpu.memory_space<vmem>>, %arg4: memref<8x128xf32, #tpu.memory_space<vmem>>) attributes {dimension_semantics = [#tpu.dimension_semantics<parallel>, #tpu.dimension_semantics<parallel>], iteration_bounds = array<i64: 1, 2>, scalar_prefetch = 0 : i64, scratch_operands = 0 : i64, tpu.core_type = #tpu.core_type<tc>, window_params = [{transform_indices = @transform_0, window_bounds = array<i64: 8, 128>}, {transform_indices = @transform_1, window_bounds = array<i64: 8, 2>}, {transform_indices = @transform_2, window_bounds = array<i64: 8, 128>}]} {
    %c0 = arith.constant 0 : index
    %c0_0 = arith.constant 0 : index
    %0 = vector.load %arg2[%c0, %c0_0] : memref<8x128xf32, #tpu.memory_space<vmem>>, vector<8x128xf32>
    %c0_1 = arith.constant 0 : index
    %c0_2 = arith.constant 0 : index
    %1 = vector.load %arg3[%c0_1, %c0_2] : memref<8x2xf32, #tpu.memory_space<vmem>>, vector<8x2xf32>
    %cst = arith.constant 0.000000e+00 : f32
    %2 = vector.broadcast %cst : f32 to vector<8x128xf32>
    %3 = arith.minimumf %0, %2 : vector<8x128xf32>
    %4 = vector.extract_strided_slice %1 {offsets = [0, 0], sizes = [8, 1], strides = [1, 1]} : vector<8x2xf32> to vector<8x1xf32>
    %5 = vector.broadcast %4 : vector<8x1xf32> to vector<8x128xf32>
    %6 = arith.mulf %3, %5 : vector<8x128xf32>
    %7 = arith.addf %0, %6 : vector<8x128xf32>
    %8 = vector.extract_strided_slice %1 {offsets = [0, 1], sizes = [8, 1], strides = [1, 1]} : vector<8x2xf32> to vector<8x1xf32>
    %9 = vector.broadcast %8 : vector<8x1xf32> to vector<8x128xf32>
    %10 = arith.addf %7, %9 : vector<8x128xf32>
    %c0_3 = arith.constant 0 : index
    %c0_4 = arith.constant 0 : index
    %11 = vector.load %arg4[%c0_3, %c0_4] : memref<8x128xf32, #tpu.memory_space<vmem>>, vector<8x128xf32>
    tpu.vector_store %arg4[%c0_3, %c0_4], %10 {strides = array<i32>} : memref<8x128xf32, #tpu.memory_space<vmem>>, vector<8x128xf32>,
    return
  }
  func.func @transform_0(%arg0: i32, %arg1: i32) -> (i32, i32) {
    %c0_i32 = arith.constant 0 : i32
    return %arg0, %arg1 : i32, i32
  }
  func.func @transform_1(%arg0: i32, %arg1: i32) -> (i32, i32) {
    %c0_i32 = arith.constant 0 : i32
    %c0_i32_0 = arith.constant 0 : i32
    return %arg0, %c0_i32 : i32, i32
  }
  func.func @transform_2(%arg0: i32, %arg1: i32) -> (i32, i32) {
    %c0_i32 = arith.constant 0 : i32
    return %arg0, %arg1 : i32, i32
  }
}

</mosaic_0001>

<bundles_post_ra>
// kernel: tpu_custom_call.1
= control target key start
LH: loop header
LB: loop body
LE: loop exit
PB: predicated region body
PF: predicated region fallthrough
CT: control target
= control target key end

     0   :  { %7 = vsyncpa [#allocation3], 0  ;;  %s669_s0 = inlined_call_operand.hbm [shape: f32[8,256], index: 0, kind: input, shape index: {}]   ;;  %s670_s1 = inlined_call_operand.vmem [shape: f32[8,2], index: 1, kind: input, shape index: {}]   ;;  %s671_s2 = inlined_call_operand.hbm [shape: f32[8,256], index: 2, kind: output, shape index: {}]  }
   0x1   :  { %9 = vsyncpa [#allocation3 + $0x1], 0 }
   0x2   :  { %10 = vsyncpa [#allocation4], 0 }
   0x3   :  { %12 = vsyncpa [#allocation4 + $0x1], 0  ;;  %s532_s9 = smov 0   ;;  %s534_s10 = smov 0  }
   0x4   :  { %s536_s11 = smov 0   ;;  %s538_s12 = smov 0  }
   0x5   :  { %s540_s13 = smov 0   ;;  %s542_s14 = smov 0  }
   0x6 LB: > { %s323_s15 = sadd.s32 4294967295, %s511_s14   ;;  %s324_s16 = sadd.s32 4294967294, %s511_s14   ;;  %s511_s14 = sphi %s542_s14, %s18_s14   ;;  %s507_s13 = sphi %s540_s13, %s683_s13   ;;  %s503_s12 = sphi %s538_s12, %s682_s12   ;;  %s499_s11 = sphi %s536_s11, %s681_s11   ;;  %s495_s10 = sphi %s534_s10, %s680_s10   ;;  %s491_s9 = sphi %s532_s9, %s679_s9  }
   0x7   : > { %s27_s17 = sadd.s32 1, %s507_s13  ;;  %s39_s18 = sadd.s32 1, %s499_s11 }
   0x8   : > { %p28_p0 = scmp.ge.s32.totalorder %s27_s17, 2  ;;  %p46_p1 = scmp.ne.s32.totalorder %s499_s11, %s495_s10 }
   0x9   : > { %p47_p2 = scmp.eq.s32.totalorder %s511_s14, 0  ;;  %p52_p3 = scmp.ne.s32.totalorder %s495_s10, %s491_s9 }
   0xa   : > { %s685_s17 = smov (%p28_p0, %s27_s17), 0  ;;  %p53_p5 = scmp.eq.s32.totalorder %s323_s15, 0 }
   0xb   : > { %p573_p4 = por %p47_p2, %p46_p1  ;;  %s35_s20 = ssub.s32 %s507_s13, %s685_s17 }
   0xc   : > { %p104_p6 = scmp.eq.s32.totalorder %s323_s15, 1  ;;  %p37_p7 = scmp.eq.s32.totalorder %s35_s20, 0 }
   0xd   : > { %p579_p8 = por %p53_p5, %p52_p3  ;;  %p110_p10 = scmp.eq.s32.totalorder %s324_s16, 1 }
   0xe   : > { %p583_p9 = por %p104_p6, %p46_p1  ;;  %p349_p13 = scmp.lt.s32.totalorder %s511_s14, 2 }
   0xf   : > { %s588_s23 = scalar_select %p37_p7, %s499_s11, %s39_s18  }
  0x10   : > { %p590_p11 = por %p110_p10, %p52_p3  ;;  %s137_s25 = sand.u32 1, %s499_s11  }
  0x11   : > { %s328_s26 = sshll.u32 %s137_s25, 3  ;;  %s329_s27 = sshll.u32 %s507_s13, 7 }
  0x12   : > { %s675_s24 = scalar_select %p590_p11, 1, 0 }
  0x13   : > { %s148_s30 = scalar_lea.hbm %s669_s0, %s329_s27  ;;  %s141_s3 = scalar_lea.vmem [#allocation2], %s328_s26 }
  0x14   : > { %s150_s4 = sshll.u32 %s141_s3, 4  ;;  %p603_p0 = pnand %p349_p13, %p573_p4  ;;  %s151_s4 = int_to_ptr.vmem [resolvable:$true] %s150_s4 }
  0x15   : > { %p330_p1 = scmp.ge.s32.totalorder %s511_s14, 1  ;;  %p155_p2 = scmp.lt.s32.totalorder %s511_s14, 3 }
  0x16   : > { %s138_s6 = scalar_lea.sflag [#allocation3], %s137_s25  ;;  %p405_p3 = pneg %p603_p0 }
  0x17   : > { %s416_s7 = scalar_lea.vmem %s151_s4, 128  ;;  %s513_s8 = smov [#allocation2]  }
  0x18   : > { %p417_p5 = scmp.ne.s32.totalorder %s151_s4, %s416_s7  ;;  %s421_s15 = sshll.u32 %s513_s8, 4  ;;  %s422_s15 = int_to_ptr.vmem [resolvable:$false] %s421_s15 }
  0x19   : > { %s423_s16 = scalar_lea.vmem %s422_s15, 256  ;;  %p424_p10 = scmp.lt.s32.totalorder %s151_s4, %s422_s15 }
  0x1a   : > { %p419_p6 = pnand %p417_p5, %p405_p3  ;;  %p425_p12 = scmp.lt.s32.totalorder %s423_s16, %s416_s7 }
  0x1c   : > { %p420_p7 = pneg %p419_p6  ;;  %p426_p4 = por %p425_p12, %p424_p10 }
  0x1e   : > { %p427_p13 = pnand %p426_p4, %p420_p7 }
  0x20   : > { %430 = shalt.err (!%p427_p13)
}
  0x21   : > { %344 = dma.hbm_to_vmem [thread:$0]  (!%p603_p0), %s148_s30, 128, %s151_s4, %s138_s6  }
  0x22   : > { %p156_p11 = pnand %p330_p1, %p155_p2 }
  0x23   : > { %s618_s18 = sand.u32 (!%p156_p11), 1, %s495_s10  }
  0x24   : > { %159 = sbr.rel (%p156_p11) target bundleno = 188 (0xbc), region = 28  ;;  %s331_s19 = sshll.u32 (!%p156_p11), %s618_s18, 3 }
  0x25   : > { %s162_s20 = scalar_lea.sflag (!%p156_p11), [#allocation3], %s618_s18  ;;  %s165_s25 = scalar_lea.vmem (!%p156_p11), [#allocation2], %s331_s19 }
  0x29   : > { %482 = dma.done.wait (%p579_p8), %s162_s20, 128  }
  0x2a   : > { %484 = vsyncadd (%p579_p8), %s162_s20, 4294967168  ;;  %v514_v0 = vmov 0   ;;  %v195_v1 = vld [vmem:[%s670_s1] sm:$0xff]  ;;  %v515_v2 = vmov 1   ;;  %s334_s21 = sshll.u32 %s503_s12, 7  ;;  %s189_s28 = scalar_lea.vmem [#allocation5], %s331_s19 }
  0x2b   : > { %401 = vset.pattern.permute.xlu0 %v514_v0  ;;  %v194_v3 = vld [vmem:[%s165_s25] sm:$0xff]  ;;  %s226_s29 = sshll.u32 %s189_s28, 4  ;;  %s224_s4 = scalar_lea.hbm %s671_s2, %s334_s21  ;;  %s227_s29 = int_to_ptr.vmem [resolvable:$true] %s226_s29 }
  0x2c   : > { %199 = vperm.xlu0 %401, %v195_v1   ;;  %v196_v4 = vmin.f32 %v194_v3, 0.0  ;;  %s211_s5 = scalar_lea.sflag [#allocation4], %s618_s18  ;;  %s431_s6 = scalar_lea.vmem %s227_s29, 128 }
  0x2d   : > { %p432_p8 = scmp.ne.s32.totalorder %s227_s29, %s431_s6  ;;  %s516_s7 = smov [#allocation5]  }
  0x2e   : > { %s435_s8 = sshll.u32 %s516_s7, 4  ;;  %s436_s8 = int_to_ptr.vmem [resolvable:$false] %s435_s8 }
  0x2f   : > { %p433_p11 = pnand %p432_p8, %p583_p9  ;;  %s437_s12 = scalar_lea.vmem %s436_s8, 256 }
  0x30   : > { %402 = vset.pattern.permute.xlu0 %v515_v2  ;;  %p438_p0 = scmp.lt.s32.totalorder %s227_s29, %s436_s8  ;;  %p439_p1 = scmp.lt.s32.totalorder %s437_s12, %s431_s6 }
  0x31   : > { %205 = vperm.xlu0 %402, %v195_v1   ;;  %p434_p12 = pneg %p433_p11 }
  0x32   : > { %p440_p2 = por %p439_p1, %p438_p0 }
  0x34   : > { %p441_p3 = pnand %p440_p2, %p434_p12 }
  0xa7   : > { %v200_v5 = vpop.permute.xlu0 %199 }
  0xa8   : > { %v202_v6 = vmul.f32 %v200_v5, %v196_v4 }
  0xaa   : > { %v203_v7 = vadd.f32 %v202_v6, %v194_v3 }
  0xac   : > { %v206_v8 = vpop.permute.xlu0 %205 }
  0xad   : > { %v208_v9 = vadd.f32 %v206_v8, %v203_v7 }
  0xaf   : > { %209 = vst [vmem:[%s189_s28] sm:$0xff] %v208_v9 }
  0xb0   : > { %444 = shalt.err (!%p441_p3)
}
  0xb1   : > { %s445_s15 = scalar_lea.hbm %s224_s4, 128  ;;  %s449_s19 = scalar_lea.hbm %s671_s2, 256 }
  0xb2   : > { %p446_p5 = scmp.ne.s32.totalorder %s224_s4, %s445_s15  ;;  %p450_p10 = scmp.lt.s32.totalorder %s224_s4, %s671_s2 }
  0xb3   : > { %p451_p4 = scmp.lt.s32.totalorder %s449_s19, %s445_s15 }
  0xb4   : > { %p447_p6 = pnand %p446_p5, %p583_p9 }
  0xb5   : > { %p452_p13 = por %p451_p4, %p450_p10 }
  0xb6   : > { %p448_p7 = pneg %p447_p6 }
  0xb8   : > { %p453_p8 = pnand %p452_p13, %p448_p7 }
  0xba   : > { %456 = shalt.err (!%p453_p8)
}
  0xbb   : > { %339 = dma.vmem_to_hbm [thread:$0]  (%p583_p9), %s227_s29, 128, %s224_s4, %s211_s5  }
  0xbc PF: > { %s238_s26 = sand.u32 1, %s491_s9   ;;  %p677_p11 = scmp.ne.s32.totalorder %s675_s24, 0 }
  0xbd   : > { %p678_p12 = scmp.ge.s32.totalorder %s511_s14, 2  ;;  %s239_s27 = scalar_lea.sflag [#allocation4], %s238_s26 }
  0xbf   : > { %p346_p0 = pnand %p678_p12, %p677_p11 }
  0xc1   : > { %p347_p1 = pneg %p346_p0 }
  0xc3   : > { %486 = dma.done.wait (%p347_p1), %s239_s27, 128  }
  0xc4   : > { %488 = vsyncadd (%p347_p1), %s239_s27, 4294967168  ;;  %s18_s14 = sadd.s32 1, %s511_s14   ;;  %s679_s9 = smov %s495_s10 }
  0xc5   : > { %p15_p2 = scmp.ge.s32.totalorder %s18_s14, 4   ;;  %s680_s10 = smov %s499_s11 }
  0xc6   : > { %s681_s11 = smov %s588_s23  ;;  %s682_s12 = smov %s507_s13 }
  0xc7   : > { %s683_s13 = smov %s685_s17  ;;  %17 = sbr.rel (!%p15_p2) target bundleno = 6 (0x6), region = 76 }
  0xcc   :  { %244 = vsyncpa [#allocation3], 1 }
  0xcd   :  { %246 = vsyncpa [#allocation3 + $0x1], 1 }
  0xce   :  { %247 = vsyncpa [#allocation4], 1 }
  0xcf   :  { %249 = vsyncpa [#allocation4 + $0x1], 1 }

</bundles_post_ra>
